<compile_context>
chip_gen: v5e
topology: v5e:2x2
jax: 0.10.0
libtpu: 0.0.40
codegen_flags: <defaults>
</compile_context>

<pallas_src>
import math

import jax
import jax.numpy as jnp
from jax.experimental import pallas as pl
from jax.experimental.pallas import tpu as pltpu


def _fbn_kernel(x_ref, p_ref, o_ref):
    # x_ref / o_ref: (R, L) tile.
    # p_ref: (2, R, 1) f32 (per-channel columns) or (2, R, L) f32 (pre-expanded),
    # with p_ref[0] = scale and p_ref[1] = shift; broadcasting covers both.
    x = x_ref[...].astype(jnp.float32)
    o_ref[...] = (x * p_ref[0] + p_ref[1]).astype(o_ref.dtype)


def _round_up(x, m):
    return ((x + m - 1) // m) * m


def _round_down(x, m):
    return (x // m) * m


def _device_kind():
    try:
        return jax.devices()[0].device_kind.lower()
    except Exception:
        return ""


def _generation_config():
    kind = _device_kind()
    if "v7" in kind:
        # 64 MiB physical VMEM -> bigger blocks need an explicit, bounded
        # scoped-VMEM limit; 2 TensorCores -> balance the grid.
        return {"block_budget": 6 << 20, "vmem_limit": 48 << 20, "megacore": True}
    if "v6" in kind:
        return {"block_budget": 4 << 20, "vmem_limit": 40 << 20, "megacore": False}
    # v5e (16 MiB default scoped VMEM), older chips, or unknown: stay small and
    # leave the scoped-VMEM default alone.
    return {"block_budget": 2 << 20, "vmem_limit": None, "megacore": False}


def _pick_tiles(rows, lanes, row_align, bytes_per_elem, block_budget):
    """Pick (row_tile, lane_tile).

    Lane tile is 128-aligned (or genuinely full extent); row tile is
    row_align-aligned (or full extent).  Lanes are grown first (longer
    contiguous DMA runs) and tiles are balanced so the edge block stays fat.
    """
    elems = max((2 * block_budget) // bytes_per_elem, 8 * 128)
    lane_cap = min(8192, max(128, _round_down(elems // row_align, 128)))
    if lanes <= lane_cap:
        lane_tile = lanes                                   # single block, full extent
    else:
        nb = pl.cdiv(lanes, lane_cap)
        lane_tile = _round_up(pl.cdiv(lanes, nb), 128)      # balanced, 128-aligned
    row_cap = max(row_align, _round_down(elems // max(lane_tile, 1), row_align))
    if rows <= row_cap:
        row_tile = rows                                     # single block, full extent
    else:
        nb = pl.cdiv(rows, row_cap)
        row_tile = _round_up(pl.cdiv(rows, nb), row_align)  # balanced, pack-aligned
    return row_tile, lane_tile


def _balance_lane_tile(other_blocks, lanes, lane_tile, want=8):
    # v7x megacore: shrink the lane tile (keeping 128 alignment) until there
    # are enough blocks to keep both TensorCores busy.
    while other_blocks * pl.cdiv(lanes, lane_tile) < want and lane_tile >= 256:
        new_tile = _round_up(lane_tile // 2, 128)
        if new_tile >= lane_tile:
            break
        lane_tile = new_tile
    return lane_tile


def frozen_batch_norm_2d(x, weight, bias, running_mean, running_var, eps=1e-5):
    """Matches FrozenBatchNorm2d.forward: y = x * scale + (b - rm * scale)."""
    N, C, H, W = x.shape
    HW = H * W

    # Fuse the frozen statistics once, in float32 (PyTorch keeps f32 buffers
    # regardless of the activation dtype).
    w32 = weight.astype(jnp.float32)
    b32 = bias.astype(jnp.float32)
    rm32 = running_mean.astype(jnp.float32)
    rv32 = running_var.astype(jnp.float32)
    scale = w32 * jax.lax.rsqrt(rv32 + jnp.float32(eps))
    shift = b32 - rm32 * scale

    # PyTorch promotion: bf16/f16 activations * f32 buffers -> f32 output.
    out_dtype = jnp.result_type(x.dtype, jnp.float32)
    in_is = jnp.dtype(x.dtype).itemsize
    out_is = jnp.dtype(out_dtype).itemsize
    pack = {4: 8, 2: 16, 1: 32}.get(in_is, 8)   # sublane packing of the activation

    cfg = _generation_config()
    budget = cfg["block_budget"]
    cparams = dict(vmem_limit_bytes=cfg["vmem_limit"])

    cost = pl.CostEstimate(
        flops=2 * N * C * HW,
        transcendentals=0,
        bytes_accessed=N * C * HW * (in_is + out_is) + 2 * C * 4,
    )

    # ---- Small-HW path: fold a channel group into the lane axis so stores are
    # full-width (HW like 49/196 would otherwise leave most lanes masked).
    g = 1
    if HW < 512 and HW % 128 != 0:
        need = 128 // math.gcd(HW, 128)      # smallest g with 128 | g*HW
        if need > 1 and C % need == 0:
            g = need

    if g > 1:
        Cg, L = C // g, g * HW
        x3 = x.reshape(N, Cg, L)
        scale_e = jnp.broadcast_to(scale[:, None], (C, HW)).reshape(Cg, L)
        shift_e = jnp.broadcast_to(shift[:, None], (C, HW)).reshape(Cg, L)
        params = jnp.stack([scale_e, shift_e], axis=0)          # (2, Cg, L) f32
        # Params are streamed per block here, so account for them in the budget.
        tcg, tl = _pick_tiles(Cg, L, pack, in_is + out_is + 8, budget)
        if cfg["megacore"]:
            tl = _balance_lane_tile(N * pl.cdiv(Cg, tcg), L, tl)
        grid = (pl.cdiv(Cg, tcg), pl.cdiv(L, tl), N)  # N innermost -> params reused
        out = pl.pallas_call(
            _fbn_kernel,
            out_shape=jax.ShapeDtypeStruct((N, Cg, L), out_dtype),
            grid=grid,
            in_specs=[
                pl.BlockSpec((pl.Squeezed(), tcg, tl), lambda ci, li, n: (n, ci, li)),
                pl.BlockSpec((2, tcg, tl), lambda ci, li, n: (0, ci, li)),
            ],
            out_specs=pl.BlockSpec(
                (pl.Squeezed(), tcg, tl), lambda ci, li, n: (n, ci, li)),
            compiler_params=pltpu.CompilerParams(
                dimension_semantics=("parallel", "parallel", "parallel"), **cparams),
            cost_estimate=cost,
        )(x3, params)
        return out.reshape(N, C, H, W)

    # ---- Standard path: (channel, spatial) tiles; cdiv grid masks ragged edges.
    x3 = x.reshape(N, C, HW)
    params = jnp.stack([scale, shift], axis=0).reshape(2, C, 1)   # (2, C, 1) f32
    tc, thw = _pick_tiles(C, HW, pack, in_is + out_is, budget)
    if cfg["megacore"]:
        thw = _balance_lane_tile(N * pl.cdiv(C, tc), HW, thw)
    grid = (N, pl.cdiv(C, tc), pl.cdiv(HW, thw))
    out = pl.pallas_call(
        _fbn_kernel,
        out_shape=jax.ShapeDtypeStruct((N, C, HW), out_dtype),
        grid=grid,
        in_specs=[
            pl.BlockSpec((pl.Squeezed(), tc, thw), lambda n, ci, hi: (n, ci, hi)),
            pl.BlockSpec((2, tc, 1), lambda n, ci, hi: (0, ci, 0)),
        ],
        out_specs=pl.BlockSpec((pl.Squeezed(), tc, thw), lambda n, ci, hi: (n, ci, hi)),
        compiler_params=pltpu.CompilerParams(
            dimension_semantics=("parallel", "parallel", "parallel"), **cparams),
        cost_estimate=cost,
    )(x3, params)
    return out.reshape(N, C, H, W)


def _reference(x, weight, bias, running_mean, running_var, eps=1e-5):
    w = weight.reshape(1, -1, 1, 1)
    b = bias.reshape(1, -1, 1, 1)
    rv = running_var.reshape(1, -1, 1, 1)
    rm = running_mean.reshape(1, -1, 1, 1)
    scale = w * jax.lax.rsqrt(rv + eps)
    bias_ = b - rm * scale
    return x * scale + bias_


if __name__ == "__main__":
    key = jax.random.PRNGKey(0)

    def make_case(shape, dtype):
        n, c, h, w = shape
        ks = jax.random.split(key, 5)
        x = jax.random.normal(ks[0], shape, dtype=jnp.float32).astype(dtype)
        weight = jnp.ones((c,), jnp.float32) + 0.1 * jax.random.normal(ks[1], (c,))
        bias = 0.1 * jax.random.normal(ks[2], (c,))
        running_mean = 0.1 * jax.random.normal(ks[3], (c,))
        running_var = jnp.ones((c,), jnp.float32) + 0.1 * jnp.abs(
            jax.random.normal(ks[4], (c,)))
        return x, weight, bias, running_mean, running_var

    cases = [
        ((2, 4, 16, 16), jnp.float32),   # basic shape, standard path (HW=256, lane-dense)
        ((2, 64, 14, 14), jnp.float32),  # small-HW folded path (HW=196 -> g=32, L=6272)
        ((1, 8, 97, 97), jnp.float32),   # standard path with cdiv grid + masked lane edge
        ((2, 16, 8, 8), jnp.bfloat16),   # low-precision input -> float32 output (promotion)
    ]
    for shape, dtype in cases:
        x, w, b, rm, rv = make_case(shape, dtype)
        out = jax.block_until_ready(frozen_batch_norm_2d(x, w, b, rm, rv))
        ref = _reference(x, w, b, rm, rv)
        assert out.shape == shape, (out.shape, shape)
        assert out.dtype == ref.dtype, (out.dtype, ref.dtype)
        tol = 1e-5 if dtype == jnp.float32 else 1e-3
        assert jnp.allclose(out, ref, atol=tol, rtol=tol), shape

    print("KERNEL_OK")
</pallas_src>

<mosaic_0001>
module attributes {stable_mosaic.version = 11 : i64} {
  func.func @_fbn_kernel(%arg0: i32, %arg1: i32, %arg2: i32, %arg3: memref<1x4x256xf32, #tpu.memory_space<vmem>>, %arg4: memref<2x4x1xf32, #tpu.memory_space<vmem>>, %arg5: memref<1x4x256xf32, #tpu.memory_space<vmem>>) attributes {dimension_semantics = [#tpu.dimension_semantics<parallel>, #tpu.dimension_semantics<parallel>, #tpu.dimension_semantics<parallel>], iteration_bounds = array<i64: 2, 1, 1>, scalar_prefetch = 0 : i64, scratch_operands = 0 : i64, tpu.core_type = #tpu.core_type<tc>, window_params = [{transform_indices = @transform_0, window_bounds = array<i64: 1, 4, 256>}, {transform_indices = @transform_1, window_bounds = array<i64: 2, 4, 1>}, {transform_indices = @transform_2, window_bounds = array<i64: 1, 4, 256>}]} {
    %c0 = arith.constant 0 : index
    %c0_0 = arith.constant 0 : index
    %c0_1 = arith.constant 0 : index
    %0 = vector.load %arg3[%c0, %c0_0, %c0_1] : memref<1x4x256xf32, #tpu.memory_space<vmem>>, vector<1x4x256xf32>
    %1 = vector.shape_cast %0 : vector<1x4x256xf32> to vector<4x256xf32>
    %c0_2 = arith.constant 0 : index
    %c0_3 = arith.constant 0 : index
    %c0_4 = arith.constant 0 : index
    %2 = vector.load %arg4[%c0_2, %c0_3, %c0_4] : memref<2x4x1xf32, #tpu.memory_space<vmem>>, vector<1x4x1xf32>
    %3 = vector.shape_cast %2 : vector<1x4x1xf32> to vector<4x1xf32>
    %4 = vector.broadcast %3 : vector<4x1xf32> to vector<4x256xf32>
    %5 = arith.mulf %1, %4 : vector<4x256xf32>
    %c1 = arith.constant 1 : index
    %c0_5 = arith.constant 0 : index
    %c0_6 = arith.constant 0 : index
    %6 = vector.load %arg4[%c1, %c0_5, %c0_6] : memref<2x4x1xf32, #tpu.memory_space<vmem>>, vector<1x4x1xf32>
    %7 = vector.shape_cast %6 : vector<1x4x1xf32> to vector<4x1xf32>
    %8 = vector.broadcast %7 : vector<4x1xf32> to vector<4x256xf32>
    %9 = arith.addf %5, %8 : vector<4x256xf32>
    %c0_7 = arith.constant 0 : index
    %c0_8 = arith.constant 0 : index
    %c0_9 = arith.constant 0 : index
    %10 = vector.load %arg5[%c0_7, %c0_8, %c0_9] : memref<1x4x256xf32, #tpu.memory_space<vmem>>, vector<1x4x256xf32>
    %11 = vector.shape_cast %10 : vector<1x4x256xf32> to vector<4x256xf32>
    %12 = vector.shape_cast %9 : vector<4x256xf32> to vector<1x4x256xf32>
    tpu.vector_store %arg5[%c0_7, %c0_8, %c0_9], %12 {strides = array<i32>} : memref<1x4x256xf32, #tpu.memory_space<vmem>>, vector<1x4x256xf32>,
    return
  }
  func.func @transform_0(%arg0: i32, %arg1: i32, %arg2: i32) -> (i32, i32, i32) {
    %c0_i32 = arith.constant 0 : i32
    return %arg0, %arg1, %arg2 : i32, i32, i32
  }
  func.func @transform_1(%arg0: i32, %arg1: i32, %arg2: i32) -> (i32, i32, i32) {
    %c0_i32 = arith.constant 0 : i32
    %c0_i32_0 = arith.constant 0 : i32
    %c0_i32_1 = arith.constant 0 : i32
    return %c0_i32, %arg1, %c0_i32_0 : i32, i32, i32
  }
  func.func @transform_2(%arg0: i32, %arg1: i32, %arg2: i32) -> (i32, i32, i32) {
    %c0_i32 = arith.constant 0 : i32
    return %arg0, %arg1, %arg2 : i32, i32, i32
  }
}

</mosaic_0001>

<bundles_post_ra>
// kernel: tpu_custom_call.1
= control target key start
LH: loop header
LB: loop body
LE: loop exit
PB: predicated region body
PF: predicated region fallthrough
CT: control target
= control target key end

     0   :  { %7 = vsyncpa [#allocation3], 0  ;;  %s705_s0 = inlined_call_operand.hbm [shape: f32[2,4,256], index: 0, kind: input, shape index: {}]   ;;  %s706_s1 = inlined_call_operand.vmem [shape: f32[2,4,1], index: 1, kind: input, shape index: {}]   ;;  %s707_s2 = inlined_call_operand.hbm [shape: f32[2,4,256], index: 2, kind: output, shape index: {}]  }
   0x1   :  { %9 = vsyncpa [#allocation3 + $0x1], 0 }
   0x2   :  { %10 = vsyncpa [#allocation4], 0 }
   0x3   :  { %12 = vsyncpa [#allocation4 + $0x1], 0  ;;  %s579_s9 = smov 0   ;;  %s581_s10 = smov 0  }
   0x4   :  { %s583_s11 = smov 0   ;;  %s585_s12 = smov 0  }
   0x5   :  { %s587_s13 = smov 0   ;;  %s589_s14 = smov 0  }
   0x6 LB: > { %s364_s15 = sadd.s32 4294967295, %s560_s14   ;;  %s365_s16 = sadd.s32 4294967294, %s560_s14   ;;  %s560_s14 = sphi %s589_s14, %s18_s14   ;;  %s556_s13 = sphi %s587_s13, %s716_s13   ;;  %s552_s12 = sphi %s585_s12, %s715_s12   ;;  %s548_s11 = sphi %s583_s11, %s714_s11   ;;  %s544_s10 = sphi %s581_s10, %s713_s10   ;;  %s540_s9 = sphi %s579_s9, %s712_s9  }
   0x7   : > { %s37_s17 = sadd.s32 1, %s556_s13  ;;  %s48_s18 = sadd.s32 1, %s548_s11 }
   0x8   : > { %p39_p0 = scmp.ge.s32.totalorder %s37_s17, 2  ;;  %p55_p1 = scmp.ne.s32.totalorder %s548_s11, %s544_s10 }
   0x9   : > { %p56_p2 = scmp.eq.s32.totalorder %s560_s14, 0  ;;  %p61_p3 = scmp.ne.s32.totalorder %s544_s10, %s540_s9 }
   0xa   : > { %s718_s17 = smov (%p39_p0, %s37_s17), 0  ;;  %p62_p5 = scmp.eq.s32.totalorder %s364_s15, 0 }
   0xb   : > { %p620_p4 = por %p56_p2, %p55_p1  ;;  %s41_s20 = ssub.s32 %s556_s13, %s718_s17 }
   0xc   : > { %p115_p6 = scmp.eq.s32.totalorder %s364_s15, 1  ;;  %p46_p7 = scmp.eq.s32.totalorder %s41_s20, 0 }
   0xd   : > { %p626_p8 = por %p62_p5, %p61_p3  ;;  %p121_p10 = scmp.eq.s32.totalorder %s365_s16, 1 }
   0xe   : > { %p630_p9 = por %p115_p6, %p55_p1  ;;  %p368_p12 = scmp.ge.s32.totalorder %s560_s14, 2 }
   0xf   : > { %s635_s23 = scalar_select %p46_p7, %s548_s11, %s48_s18  }
  0x10   : > { %p637_p11 = por %p121_p10, %p61_p3  ;;  %p395_p13 = scmp.lt.s32.totalorder %s560_s14, 2 }
  0x11   : > { %s148_s25 = sand.u32 1, %s548_s11   ;;  %s381_s27 = sshll.u32 %s556_s13, 3 }
  0x12   : > { %s369_s26 = sshll.u32 %s148_s25, 3  ;;  %s161_s30 = scalar_lea.hbm %s705_s0, %s381_s27 }
  0x13   : > { %s152_s3 = scalar_lea.vmem [#allocation2], %s369_s26  ;;  %s163_s5 = sshll.u32 %s161_s30, 4  ;;  %s164_s5 = int_to_ptr.hbm [resolvable:$true] %s163_s5 }
  0x14   : > { %s165_s4 = sshll.u32 %s152_s3, 4  ;;  %p388_p0 = pnand %p395_p13, %p620_p4  ;;  %s166_s4 = int_to_ptr.vmem [resolvable:$true] %s165_s4 }
  0x15   : > { %p372_p1 = scmp.ge.s32.totalorder %s560_s14, 1  ;;  %p170_p2 = scmp.lt.s32.totalorder %s560_s14, 3 }
  0x16   : > { %s149_s6 = scalar_lea.sflag [#allocation3], %s148_s25 }
  0x17   : > { %390 = dma.hbm_to_vmem [thread:$0]  (!%p388_p0), %s164_s5, 128, %s166_s4, %s149_s6  }
  0x18   : > { %p171_p3 = pnand %p372_p1, %p170_p2 }
  0x19   : > { %s653_s7 = sand.u32 (!%p171_p3), 1, %s544_s10  }
  0x1a   : > { %174 = sbr.rel (%p171_p3) target bundleno = 164 (0xa4), region = 28  ;;  %s373_s8 = sshll.u32 (!%p171_p3), %s653_s7, 3 }
  0x1b   : > { %s177_s15 = scalar_lea.sflag (!%p171_p3), [#allocation3], %s653_s7  ;;  %s180_s16 = scalar_lea.vmem (!%p171_p3), [#allocation2], %s373_s8 }
  0x1f   : > { %531 = dma.done.wait (%p626_p8), %s177_s15, 128  }
  0x20   : > { %533 = vsyncadd (%p626_p8), %s177_s15, 4294967168  ;;  %v562_v0 = vmov 0   ;;  %v213_v1 = vld [vmem:[%s706_s1] sm:$0xf]  ;;  %v375_v2 = vld [vmem:[%s706_s1 + $0x4] sm:$0xf] }
  0x21   : > { %447 = vset.pattern.permute.xlu0 %v562_v0  ;;  %v563_v3 = vmov 839922192   ;;  %s382_s21 = sshll.u32 %s552_s12, 3  ;;  %v212_v8 = vld [vmem:[%s180_s16] sm:$0xff]  ;;  %s205_s29 = scalar_lea.vmem [#allocation5], %s373_s8 }
  0x22   : > { %216 = vperm.xlu0 %447, %v213_v1   ;;  %v219_v4 = vunpack.c.l.s4 %v563_v3  ;;  %s253_s28 = scalar_lea.hbm %s707_s2, %s382_s21  ;;  %s255_s30 = sshll.u32 %s205_s29, 4  ;;  %s256_s30 = int_to_ptr.vmem [resolvable:$true] %s255_s30 }
  0x23   : > { %s257_s3 = sshll.u32 %s253_s28, 4  ;;  %s238_s4 = scalar_lea.sflag [#allocation4], %s653_s7  ;;  %s258_s3 = int_to_ptr.hbm [resolvable:$true] %s257_s3 }
  0x24   : > { %v220_v6 = vunpack.c.0.s8 %v219_v4  ;;  %s492_s5 = sshra.s32 %s258_s3, 4  ;;  %s498_s8 = scalar_lea.hbm %s707_s2, 16  ;;  %s493_s5 = int_to_ptr.hbm [resolvable:$true] %s492_s5 }
  0x25   : > { %s494_s12 = scalar_lea.hbm %s493_s5, 8  ;;  %p499_p7 = scmp.lt.s32.totalorder %s493_s5, %s707_s2 }
  0x26   : > { %p495_p4 = scmp.ne.s32.totalorder %s493_s5, %s494_s12  ;;  %p500_p8 = scmp.lt.s32.totalorder %s498_s8, %s494_s12 }
  0x28   : > { %p496_p5 = pnand %p495_p4, %p630_p9  ;;  %p501_p10 = por %p500_p8, %p499_p7 }
  0x2a   : > { %228 = vperm.xlu0 %447, %v375_v2   ;;  %p497_p6 = pneg %p496_p5 }
  0x2c   : > { %p502_p13 = pnand %p501_p10, %p497_p6 }
  0x94   : > { %v217_v5 = vpop.permute.xlu0 %216 }
  0x95   : > { %v221_v7 = vperm.slane %v217_v5, %v220_v6 }
  0x97   : > { %v223_v10 = vmul.f32 %v221_v7, %v212_v8 }
  0x9c   : > { %v229_v9 = vpop.permute.xlu0 %228 }
  0x9d   : > { %v233_v11 = vperm.slane %v229_v9, %v220_v6 }
  0x9f   : > { %v235_v12 = vadd.f32 %v233_v11, %v223_v10 }
  0xa1   : > { %236 = vst [vmem:[%s205_s29] sm:$0xff] %v235_v12 }
  0xa2   : > { %505 = shalt.err (!%p502_p13)
}
  0xa3   : > { %385 = dma.vmem_to_hbm [thread:$0]  (%p630_p9), %s256_s30, 128, %s258_s3, %s238_s4  }
  0xa4 PF: > { %s269_s7 = sand.u32 1, %s540_s9   ;;  %p392_p0 = pnand %p368_p12, %p637_p11 }
  0xa5   : > { %s270_s19 = scalar_lea.sflag [#allocation4], %s269_s7 }
  0xa6   : > { %p393_p1 = pneg %p392_p0 }
  0xa8   : > { %535 = dma.done.wait (%p393_p1), %s270_s19, 128  }
  0xa9   : > { %537 = vsyncadd (%p393_p1), %s270_s19, 4294967168  ;;  %s18_s14 = sadd.s32 1, %s560_s14   ;;  %s712_s9 = smov %s544_s10 }
  0xaa   : > { %p15_p2 = scmp.ge.s32.totalorder %s18_s14, 4   ;;  %s713_s10 = smov %s548_s11 }
  0xab   : > { %s714_s11 = smov %s635_s23  ;;  %s715_s12 = smov %s556_s13 }
  0xac   : > { %s716_s13 = smov %s718_s17  ;;  %17 = sbr.rel (!%p15_p2) target bundleno = 6 (0x6), region = 77 }
  0xb1   :  { %276 = vsyncpa [#allocation3], 1 }
  0xb2   :  { %278 = vsyncpa [#allocation3 + $0x1], 1 }
  0xb3   :  { %279 = vsyncpa [#allocation4], 1 }
  0xb4   :  { %281 = vsyncpa [#allocation4 + $0x1], 1 }

</bundles_post_ra>
